<compile_context>
chip_gen: v7x
topology: tpu7x:2x2x1
jax: 0.10.0
libtpu: 0.0.40
codegen_flags: <defaults>
</compile_context>

<pallas_src>
import jax
import jax.numpy as jnp
from jax.experimental import pallas as pl
from jax.experimental.pallas import tpu as pltpu

LANE = 128     # vreg lane width; batch tile must be a multiple of this
SUBLANE = 8    # vreg sublane width; feature dims padded to this


def _round_up(x, m):
    return (x + m - 1) // m * m


def mlp_kernel(x_ref, w1t_ref, b1_ref, w2t_ref, b2_ref, w3t_ref, b3_ref, o_ref):
    # x_ref:   (d_in, T)      batch on lanes
    # w1t_ref: (H, d_in)      b1_ref: (H, 1)
    # w2t_ref: (H, H)         b2_ref: (H, 1)
    # w3t_ref: (O8, H)        b3_ref: (O8, 1)
    # o_ref:   (O8, T)
    x = x_ref[...]

    # ---- Layer 1: Linear + Tanh --------------------------------------------
    if x_ref.shape[0] == 1:
        # d_in == 1: degenerate K=1 contraction -> VPU broadcast multiply.
        h1 = w1t_ref[...] * x                                   # (H,1)*(1,T) -> (H,T)
    else:
        h1 = jnp.dot(w1t_ref[...], x, preferred_element_type=jnp.float32)
    h1 = jnp.tanh(h1 + b1_ref[...])                             # (H, T)

    # ---- Layer 2: Linear + Tanh (MXU) ---------------------------------------
    h2 = jnp.dot(w2t_ref[...], h1.astype(w2t_ref.dtype),
                 preferred_element_type=jnp.float32)
    h2 = jnp.tanh(h2 + b2_ref[...])                             # (H, T)

    # ---- Layer 3: Linear (MXU) ----------------------------------------------
    out = jnp.dot(w3t_ref[...], h2.astype(w3t_ref.dtype),
                  preferred_element_type=jnp.float32)
    o_ref[...] = (out + b3_ref[...]).astype(o_ref.dtype)        # (O8, T)


def prepare_mlp_params(params, mxu_dtype=jnp.float32):
    """Transpose / pad weights once (hoisted out of the per-call path).

    params: W1 (in,hidden), b1 (hidden,), W2 (hidden,hidden), b2 (hidden,),
            W3 (hidden,out), b3 (out,)  -- (in_features, out_features) layout.
    mxu_dtype: dtype for the layer-2/3 MXU operands (bf16 recommended on
               v6e/v7x if the accuracy budget allows).
    """
    w1, b1 = params["W1"], params["b1"]
    w2, b2 = params["W2"], params["b2"]
    w3, b3 = params["W3"], params["b3"]

    hidden = w1.shape[1]
    out_dim = w3.shape[1]
    o_pad = _round_up(max(out_dim, 1), SUBLANE)     # out rows padded to sublane width

    w3t = jnp.pad(w3.T, ((0, o_pad - out_dim), (0, 0)))          # (O8, H)
    b3c = jnp.pad(b3.reshape(-1, 1), ((0, o_pad - out_dim), (0, 0)))

    return {
        "W1T": w1.T.astype(jnp.float32),                         # (H, d_in)  VPU path
        "b1": b1.reshape(-1, 1).astype(jnp.float32),             # (H, 1)
        "W2T": w2.T.astype(mxu_dtype),                           # (H, H)
        "b2": b2.reshape(-1, 1).astype(jnp.float32),             # (H, 1)
        "W3T": w3t.astype(mxu_dtype),                            # (O8, H)
        "b3": b3c.astype(jnp.float32),                           # (O8, 1)
        "hidden": hidden,
        "out_dim": out_dim,
    }


def mlp_forward(x, prepared, *, tile_n=4096):
    """x: (N, input_dim) float32. prepared: output of prepare_mlp_params."""
    n, d_in = x.shape
    hidden = prepared["hidden"]
    out_dim = prepared["out_dim"]
    o_pad = prepared["W3T"].shape[0]

    # Batch on the lane axis: x -> (d_in, N). For d_in == 1 this is a free reshape.
    x_t = x.T

    # Lane-dense batch tiling: tile_n multiple of 128, batch padded to the tile.
    n_lane = _round_up(max(n, 1), LANE)
    tile_n = max(LANE, _round_up(min(tile_n, n_lane), LANE))
    # v7x megacore: ensure >= 2 grid steps whenever the batch allows it so the
    # "parallel" axis actually shards across both TensorCores.
    if n_lane >= 2 * LANE:
        tile_n = min(tile_n, _round_up(pl.cdiv(n_lane, 2), LANE))
    n_pad = _round_up(n_lane, tile_n)

    x_p = jnp.pad(x_t, ((0, 0), (0, n_pad - n)))

    grid = (n_pad // tile_n,)

    out_padded = pl.pallas_call(
        mlp_kernel,
        out_shape=jax.ShapeDtypeStruct((o_pad, n_pad), x.dtype),
        grid=grid,
        in_specs=[
            pl.BlockSpec((d_in, tile_n), lambda i: (0, i)),       # x tile (pipelined)
            pl.BlockSpec((hidden, d_in), lambda i: (0, 0)),       # weights: VMEM-resident
            pl.BlockSpec((hidden, 1), lambda i: (0, 0)),
            pl.BlockSpec((hidden, hidden), lambda i: (0, 0)),
            pl.BlockSpec((hidden, 1), lambda i: (0, 0)),
            pl.BlockSpec((o_pad, hidden), lambda i: (0, 0)),
            pl.BlockSpec((o_pad, 1), lambda i: (0, 0)),
        ],
        out_specs=pl.BlockSpec((o_pad, tile_n), lambda i: (0, i)),  # lane-dense slab
        compiler_params=pltpu.CompilerParams(
            dimension_semantics=("parallel",)),
    )(x_p, prepared["W1T"], prepared["b1"], prepared["W2T"], prepared["b2"],
      prepared["W3T"], prepared["b3"])

    # (O8, N_pad) -> (N, out_dim); for out_dim == 1 the transpose is a reshape.
    return out_padded[:out_dim, :n].T


def init_mlp_params(key, input_dim=1, hidden_dim=64, output_dim=1,
                    dtype=jnp.float32):
    """Mimics nn.Linear's U(-1/sqrt(fan_in), 1/sqrt(fan_in)) init.
    Weights stored as (in_features, out_features); biases as (out_features,)."""
    ks = jax.random.split(key, 6)

    def linear(kw, kb, fan_in, fan_out):
        bound = 1.0 / jnp.sqrt(jnp.float32(fan_in))
        w = jax.random.uniform(kw, (fan_in, fan_out), dtype, -bound, bound)
        b = jax.random.uniform(kb, (fan_out,), dtype, -bound, bound)
        return w, b

    w1, b1 = linear(ks[0], ks[1], input_dim, hidden_dim)
    w2, b2 = linear(ks[2], ks[3], hidden_dim, hidden_dim)
    w3, b3 = linear(ks[4], ks[5], hidden_dim, output_dim)
    return {"W1": w1, "b1": b1, "W2": w2, "b2": b2, "W3": w3, "b3": b3}


def mlp_reference(x, p):
    h1 = jnp.tanh(x @ p["W1"] + p["b1"])
    h2 = jnp.tanh(h1 @ p["W2"] + p["b2"])
    return h2 @ p["W3"] + p["b3"]


if __name__ == "__main__":
    key = jax.random.PRNGKey(0)
    k_param, k_x = jax.random.split(key)

    input_dim, hidden_dim, output_dim = 1, 64, 1
    batch = 8

    params = init_mlp_params(k_param, input_dim, hidden_dim, output_dim)
    prepared = prepare_mlp_params(params)   # pad/transpose once, reuse per call

    noise = jax.random.normal(k_x, (batch, input_dim), dtype=jnp.float32)

    out = mlp_forward(noise, prepared)
    out = jax.block_until_ready(out)

    ref = mlp_reference(noise, params)
    assert out.shape == (batch, output_dim), out.shape
    assert jnp.allclose(out, ref, atol=1e-5, rtol=1e-5), "mismatch vs reference"

    print("KERNEL_OK")
</pallas_src>

<mosaic_0001>
module attributes {stable_mosaic.version = 11 : i64} {
  func.func @mlp_kernel(%arg0: i32, %arg1: memref<1x128xf32, #tpu.memory_space<vmem>>, %arg2: memref<64x1xf32, #tpu.memory_space<vmem>>, %arg3: memref<64x1xf32, #tpu.memory_space<vmem>>, %arg4: memref<64x64xf32, #tpu.memory_space<vmem>>, %arg5: memref<64x1xf32, #tpu.memory_space<vmem>>, %arg6: memref<8x64xf32, #tpu.memory_space<vmem>>, %arg7: memref<8x1xf32, #tpu.memory_space<vmem>>, %arg8: memref<8x128xf32, #tpu.memory_space<vmem>>) attributes {dimension_semantics = [#tpu.dimension_semantics<parallel>], iteration_bounds = array<i64: 1>, scalar_prefetch = 0 : i64, scratch_operands = 0 : i64, tpu.core_type = #tpu.core_type<tc>, window_params = [{transform_indices = @transform_0, window_bounds = array<i64: 1, 128>}, {pipeline_mode = #tpu.pipeline_mode<synchronous>, transform_indices = @transform_1, window_bounds = array<i64: 64, 1>}, {pipeline_mode = #tpu.pipeline_mode<synchronous>, transform_indices = @transform_2, window_bounds = array<i64: 64, 1>}, {pipeline_mode = #tpu.pipeline_mode<synchronous>, transform_indices = @transform_3, window_bounds = array<i64: 64, 64>}, {pipeline_mode = #tpu.pipeline_mode<synchronous>, transform_indices = @transform_4, window_bounds = array<i64: 64, 1>}, {pipeline_mode = #tpu.pipeline_mode<synchronous>, transform_indices = @transform_5, window_bounds = array<i64: 8, 64>}, {pipeline_mode = #tpu.pipeline_mode<synchronous>, transform_indices = @transform_6, window_bounds = array<i64: 8, 1>}, {transform_indices = @transform_7, window_bounds = array<i64: 8, 128>}]} {
    %c0 = arith.constant 0 : index
    %c0_0 = arith.constant 0 : index
    %0 = vector.load %arg1[%c0, %c0_0] : memref<1x128xf32, #tpu.memory_space<vmem>>, vector<1x128xf32>
    %c0_1 = arith.constant 0 : index
    %c0_2 = arith.constant 0 : index
    %1 = vector.load %arg2[%c0_1, %c0_2] : memref<64x1xf32, #tpu.memory_space<vmem>>, vector<64x1xf32>
    %2 = vector.broadcast %1 : vector<64x1xf32> to vector<64x128xf32>
    %3 = vector.broadcast %0 : vector<1x128xf32> to vector<64x128xf32>
    %4 = arith.mulf %2, %3 : vector<64x128xf32>
    %c0_3 = arith.constant 0 : index
    %c0_4 = arith.constant 0 : index
    %5 = vector.load %arg3[%c0_3, %c0_4] : memref<64x1xf32, #tpu.memory_space<vmem>>, vector<64x1xf32>
    %6 = vector.broadcast %5 : vector<64x1xf32> to vector<64x128xf32>
    %7 = arith.addf %4, %6 : vector<64x128xf32>
    %8 = math.tanh %7 : vector<64x128xf32>
    %c0_5 = arith.constant 0 : index
    %c0_6 = arith.constant 0 : index
    %9 = vector.load %arg4[%c0_5, %c0_6] : memref<64x64xf32, #tpu.memory_space<vmem>>, vector<64x64xf32>
    %cst = arith.constant dense<0.000000e+00> : vector<64x128xf32>
    %10 = tpu.matmul %9, %8, %cst {dimension_numbers = #tpu.dot_dimension_numbers<[1], [0], [0], [1], [0, 0, 1, 1], [], []>} : vector<64x64xf32>, vector<64x128xf32>, vector<64x128xf32> -> vector<64x128xf32>
    %c0_7 = arith.constant 0 : index
    %c0_8 = arith.constant 0 : index
    %11 = vector.load %arg5[%c0_7, %c0_8] : memref<64x1xf32, #tpu.memory_space<vmem>>, vector<64x1xf32>
    %12 = vector.broadcast %11 : vector<64x1xf32> to vector<64x128xf32>
    %13 = arith.addf %10, %12 : vector<64x128xf32>
    %14 = math.tanh %13 : vector<64x128xf32>
    %c0_9 = arith.constant 0 : index
    %c0_10 = arith.constant 0 : index
    %15 = vector.load %arg6[%c0_9, %c0_10] : memref<8x64xf32, #tpu.memory_space<vmem>>, vector<8x64xf32>
    %cst_11 = arith.constant dense<0.000000e+00> : vector<8x128xf32>
    %16 = tpu.matmul %15, %14, %cst_11 {dimension_numbers = #tpu.dot_dimension_numbers<[1], [0], [0], [1], [0, 0, 1, 1], [], []>} : vector<8x64xf32>, vector<64x128xf32>, vector<8x128xf32> -> vector<8x128xf32>
    %c0_12 = arith.constant 0 : index
    %c0_13 = arith.constant 0 : index
    %17 = vector.load %arg7[%c0_12, %c0_13] : memref<8x1xf32, #tpu.memory_space<vmem>>, vector<8x1xf32>
    %18 = vector.broadcast %17 : vector<8x1xf32> to vector<8x128xf32>
    %19 = arith.addf %16, %18 : vector<8x128xf32>
    %c0_14 = arith.constant 0 : index
    %c0_15 = arith.constant 0 : index
    %20 = vector.load %arg8[%c0_14, %c0_15] : memref<8x128xf32, #tpu.memory_space<vmem>>, vector<8x128xf32>
    tpu.vector_store %arg8[%c0_14, %c0_15], %19 {strides = array<i32>} : memref<8x128xf32, #tpu.memory_space<vmem>>, vector<8x128xf32>,
    return
  }
  func.func @transform_0(%arg0: i32) -> (i32, i32) {
    %c0_i32 = arith.constant 0 : i32
    %c0_i32_0 = arith.constant 0 : i32
    return %c0_i32, %arg0 : i32, i32
  }
  func.func @transform_1(%arg0: i32) -> (i32, i32) {
    %c0_i32 = arith.constant 0 : i32
    %c0_i32_0 = arith.constant 0 : i32
    %c0_i32_1 = arith.constant 0 : i32
    return %c0_i32, %c0_i32_0 : i32, i32
  }
  func.func @transform_2(%arg0: i32) -> (i32, i32) {
    %c0_i32 = arith.constant 0 : i32
    %c0_i32_0 = arith.constant 0 : i32
    %c0_i32_1 = arith.constant 0 : i32
    return %c0_i32, %c0_i32_0 : i32, i32
  }
  func.func @transform_3(%arg0: i32) -> (i32, i32) {
    %c0_i32 = arith.constant 0 : i32
    %c0_i32_0 = arith.constant 0 : i32
    %c0_i32_1 = arith.constant 0 : i32
    return %c0_i32, %c0_i32_0 : i32, i32
  }
  func.func @transform_4(%arg0: i32) -> (i32, i32) {
    %c0_i32 = arith.constant 0 : i32
    %c0_i32_0 = arith.constant 0 : i32
    %c0_i32_1 = arith.constant 0 : i32
    return %c0_i32, %c0_i32_0 : i32, i32
  }
  func.func @transform_5(%arg0: i32) -> (i32, i32) {
    %c0_i32 = arith.constant 0 : i32
    %c0_i32_0 = arith.constant 0 : i32
    %c0_i32_1 = arith.constant 0 : i32
    return %c0_i32, %c0_i32_0 : i32, i32
  }
  func.func @transform_6(%arg0: i32) -> (i32, i32) {
    %c0_i32 = arith.constant 0 : i32
    %c0_i32_0 = arith.constant 0 : i32
    %c0_i32_1 = arith.constant 0 : i32
    return %c0_i32, %c0_i32_0 : i32, i32
  }
  func.func @transform_7(%arg0: i32) -> (i32, i32) {
    %c0_i32 = arith.constant 0 : i32
    %c0_i32_0 = arith.constant 0 : i32
    return %c0_i32, %arg0 : i32, i32
  }
}

</mosaic_0001>

<bundles_post_ra>
// kernel: tpu_custom_call.1
= control target key start
LH: loop header
LB: loop body
LE: loop exit
PB: predicated region body
PF: predicated region fallthrough
CT: control target
= control target key end

     0   :  { %v616_v2 = vmov 0   ;;  %s787_s0 = inlined_call_operand.vmem [shape: f32[1,128], index: 0, kind: input, shape index: {}]   ;;  %s788_s1 = inlined_call_operand.vmem [shape: f32[64,1], index: 1, kind: input, shape index: {}]   ;;  %s789_s2 = inlined_call_operand.vmem [shape: f32[64,1], index: 2, kind: input, shape index: {}]   ;;  %s790_s3 = inlined_call_operand.vmem [shape: f32[64,64], index: 3, kind: input, shape index: {}]   ;;  %s791_s4 = inlined_call_operand.vmem [shape: f32[64,1], index: 4, kind: input, shape index: {}]   ;;  %s792_s5 = inlined_call_operand.vmem [shape: f32[8,64], index: 5, kind: input, shape index: {}]   ;;  %s793_s6 = inlined_call_operand.vmem [shape: f32[8,1], index: 6, kind: input, shape index: {}]   ;;  %s794_s7 = inlined_call_operand.hbm [shape: f32[8,128], index: 7, kind: output, shape index: {}]  }
   0x1   :  { %v90_v0 = vld [vmem:[%s789_s2] sm:$0xff]  ;;  %559 = vset.pattern.permute.xlu1 %v616_v2  ;;  %558 = vset.pattern.permute.xlu0 %v616_v2  ;;  %v91_v3 = vld [vmem:[%s789_s2 + $0x8] sm:$0xff]  ;;  %v31_v5 = vld [vmem:[%s788_s1 + $0x18] sm:$0xff] }
   0x2   :  { %v28_v1 = vld [vmem:[%s788_s1] sm:$0xff]  ;;  %100 = vperm.xlu1 %559, %v90_v0   ;;  %v29_v4 = vld [vmem:[%s788_s1 + $0x8] sm:$0xff]  ;;  %v30_v6 = vld [vmem:[%s788_s1 + $0x10] sm:$0xff] }
   0x3   :  { %38 = vperm.xlu0 %558, %v28_v1  }
   0x6   :  { %105 = vperm.xlu1 %559, %v91_v3  }
   0x7   :  { %43 = vperm.xlu0 %558, %v29_v4  }
   0x8   :  { %12 = vsyncpa [#allocation3], 0  ;;  %v93_v7 = vld [vmem:[%s789_s2 + $0x18] sm:$0xff]  ;;  %v92_v8 = vld [vmem:[%s789_s2 + $0x10] sm:$0xff]  ;;  %vm210_vm0 = vcmask 523264   ;;  %vm618_vm1 = vmmov 0  }
   0x9   :  { %v33_v9 = vld [vmem:[%s788_s1 + $0x28] sm:$0xff]  ;;  %v32_v10 = vld [vmem:[%s788_s1 + $0x20] sm:$0xff]  ;;  %v35_v13 = vld [vmem:[%s788_s1 + $0x38] sm:$0xff]  ;;  %s620_s17 = smov [#allocation2]  }
   0xa   :  { %53 = vperm.xlu1 %559, %v31_v5   ;;  %v95_v11 = vld [vmem:[%s789_s2 + $0x28] sm:$0xff]  ;;  %v94_v12 = vld [vmem:[%s789_s2 + $0x20] sm:$0xff]  ;;  %v34_v14 = vld [vmem:[%s788_s1 + $0x30] sm:$0xff]  ;;  %s435_s18 = sshll.u32 %s620_s17, 4  ;;  %s436_s18 = int_to_ptr.vmem [resolvable:$true] %s435_s18 }
   0xb   :  { %48 = vperm.xlu0 %558, %v30_v6   ;;  %v97_v15 = vld [vmem:[%s789_s2 + $0x38] sm:$0xff]  ;;  %v96_v16 = vld [vmem:[%s789_s2 + $0x30] sm:$0xff]  ;;  %v163_v17 = vld [vmem:[%s791_s4 + $0x8] sm:$0xff]  ;;  %s592_s19 = scalar_lea.vmem %s436_s18, 128  ;;  %p597_p1 = scmp.lt.s32.totalorder %s436_s18, %s436_s18 }
   0xc   :  { %v162_v18 = vld [vmem:[%s791_s4] sm:$0xff]  ;;  %v165_v19 = vld [vmem:[%s791_s4 + $0x18] sm:$0xff]  ;;  %v164_v20 = vld [vmem:[%s791_s4 + $0x10] sm:$0xff]  ;;  %p593_p0 = scmp.ne.s32.totalorder %s436_s18, %s592_s19  ;;  %p598_p2 = scmp.lt.s32.totalorder %s592_s19, %s592_s19 }
   0xd   :  { %v167_v21 = vld [vmem:[%s791_s4 + $0x28] sm:$0xff]  ;;  %v166_v22 = vld [vmem:[%s791_s4 + $0x20] sm:$0xff]  ;;  %v169_v23 = vld [vmem:[%s791_s4 + $0x38] sm:$0xff] }
   0xe   :  { %115 = vperm.xlu1 %559, %v93_v7   ;;  %v168_v24 = vld [vmem:[%s791_s4 + $0x30] sm:$0xff]  ;;  %v349_v25 = vld [vmem:[%s793_s6] sm:$0xff]  ;;  %p599_p3 = por %p598_p2, %p597_p1 }
   0xf   :  { %110 = vperm.xlu0 %558, %v92_v8   ;;  %v154_v26 = vld [vmem:[%s790_s3] sm:$0xff]  ;;  %v155_v8 = vld [vmem:[%s790_s3 + $0x8] sm:$0xff] }
  0x10   :  { %494 = vmatprep.mubr.msk.f32.mxu0 %vm210_vm0, %v154_v26  ;;  %v443_v27 = vld [vmem:[%s787_s0] ss:$0 sm:$0xff]  ;;  %p600_p4 = pnand %p599_p3, %p593_p0 }
  0x12   :  { %63 = vperm.xlu1 %559, %v33_v9   ;;  %v156_v9 = vld [vmem:[%s790_s3 + $0x10] sm:$0xff] }
  0x13   :  { %58 = vperm.xlu0 %558, %v32_v10   ;;  %v157_v10 = vld [vmem:[%s790_s3 + $0x18] sm:$0xff] }
  0x16   :  { %125 = vperm.xlu1 %559, %v95_v11   ;;  %v158_v11 = vld [vmem:[%s790_s3 + $0x20] sm:$0xff] }
  0x17   :  { %120 = vperm.xlu0 %558, %v94_v12   ;;  %v159_v12 = vld [vmem:[%s790_s3 + $0x28] sm:$0xff] }
  0x1a   :  { %73 = vperm.xlu1 %559, %v35_v13   ;;  %v160_v13 = vld [vmem:[%s790_s3 + $0x30] sm:$0xff] }
  0x1b   :  { %68 = vperm.xlu0 %558, %v34_v14   ;;  %v161_v14 = vld [vmem:[%s790_s3 + $0x38] sm:$0xff] }
  0x1e   :  { %135 = vperm.xlu1 %559, %v97_v15   ;;  %v617_v15 = vmov 0.0|0.0  }
  0x1f   :  { %130 = vperm.xlu0 %558, %v96_v16   ;;  %541 = vmatprep.subr.bf16.mxu1 %v617_v15  ;;  %v619_v16 = vmov 0.0  }
  0x20   :  { %522 = vmatprep.mubr.msk.f32.mxu1 %vm618_vm1, %v619_v16 }
  0x22   :  { %177 = vperm.xlu1 %559, %v163_v17  }
  0x23   :  { %172 = vperm.xlu0 %558, %v162_v18  }
  0x26   :  { %187 = vperm.xlu1 %559, %v165_v19  }
  0x27   :  { %182 = vperm.xlu0 %558, %v164_v20  }
  0x2a   :  { %197 = vperm.xlu1 %559, %v167_v21  }
  0x2b   :  { %192 = vperm.xlu0 %558, %v166_v22  }
  0x2e   :  { %207 = vperm.xlu1 %559, %v169_v23  }
  0x2f   :  { %202 = vperm.xlu0 %558, %v168_v24  }
  0x33   :  { %352 = vperm.xlu0 %558, %v349_v25  }
  0x81   :  { %v101_v28 = vpop.permute.xlu1 %100 }
  0x82   :  { %v39_v29 = vpop.permute.xlu0 %38 }
  0x83   :  { %v82_v30 = vmul.f32 %v443_v27, %v39_v29 }
  0x85   :  { %v138_v31 = vadd.f32 %v101_v28, %v82_v30  ;;  %v106_v32 = vpop.permute.xlu1 %105 }
  0x86   :  { %v44_v33 = vpop.permute.xlu0 %43 }
  0x87   :  { %v83_v34 = vmul.f32 %v443_v27, %v44_v33  ;;  %560 = vtanh.f32 %v138_v31 }
  0x89   :  { %v139_v35 = vadd.f32 %v106_v32, %v83_v34  ;;  %v54_v36 = vpop.permute.xlu1 %53 }
  0x8a   :  { %v49_v37 = vpop.permute.xlu0 %48  ;;  %v85_v38 = vmul.f32 %v443_v27, %v54_v36 }
  0x8b   :  { %562 = vtanh.f32 %v139_v35  ;;  %v84_v39 = vmul.f32 %v443_v27, %v49_v37 }
  0x8d   :  { %v116_v40 = vpop.permute.xlu1 %115 }
  0x8e   :  { %v111_v41 = vpop.permute.xlu0 %110  ;;  %v141_v42 = vadd.f32 %v116_v40, %v85_v38 }
  0x8f   :  { %v140_v43 = vadd.f32 %v111_v41, %v84_v39 }
  0x90   :  { %564 = vtanh.f32 %v141_v42 }
  0x91   :  { %566 = vtanh.f32 %v140_v43  ;;  %v64_v44 = vpop.permute.xlu1 %63  ;;  %v561_v46 = vpop.eup %560 }
  0x92   :  { %v59_v45 = vpop.permute.xlu0 %58  ;;  %v87_v48 = vmul.f32 %v443_v27, %v64_v44 }
  0x93   :  { %v86_v49 = vmul.f32 %v443_v27, %v59_v45 }
  0x95   :  { %v563_v47 = vpop.eup %562  ;;  %v126_v50 = vpop.permute.xlu1 %125 }
  0x96   :  { %v121_v51 = vpop.permute.xlu0 %120  ;;  %v525_v52 = vpack.c.bf16 %v563_v47, %v561_v46  ;;  %v143_v53 = vadd.f32 %v126_v50, %v87_v48 }
  0x97   :  { %v142_v54 = vadd.f32 %v121_v51, %v86_v49 }
  0x98   :  { %526 = vmatprep.subr.bf16.mxu0 %v525_v52  ;;  %568 = vtanh.f32 %v143_v53  ;;  %v348_v53 = vld [vmem:[%s792_s5] sm:$0xff] }
  0x99   :  { %528 = vmatpush3.bf16.msra.mxu0 %v525_v52  ;;  %570 = vtanh.f32 %v142_v54  ;;  %v74_v55 = vpop.permute.xlu1 %73 }
  0x9a   :  { %v69_v56 = vpop.permute.xlu0 %68  ;;  %v565_v57 = vpop.eup %564  ;;  %v89_v59 = vmul.f32 %v443_v27, %v74_v55 }
  0x9b   :  { %v567_v58 = vpop.eup %566  ;;  %v88_v60 = vmul.f32 %v443_v27, %v69_v56 }
  0x9c   :  { %v529_v61 = vpack.c.bf16 %v565_v57, %v567_v58 }
  0x9d   :  { %v136_v62 = vpop.permute.xlu1 %135 }
  0x9e   :  { %v131_v63 = vpop.permute.xlu0 %130  ;;  %v145_v0 = vadd.f32 %v136_v62, %v89_v59  ;;  %530 = vmatprep.subr.bf16.mxu0 %v529_v61 }
  0x9f   :  { %v144_v1 = vadd.f32 %v131_v63, %v88_v60  ;;  %532 = vmatpush3.bf16.msra.mxu0 %v529_v61 }
  0xa0   :  { %572 = vtanh.f32 %v145_v0 }
  0xa1   :  { %574 = vtanh.f32 %v144_v1  ;;  %v178_v17 = vpop.permute.xlu1 %177 }
  0xa2   :  { %v569_v2 = vpop.eup %568  ;;  %v173_v18 = vpop.permute.xlu0 %172 }
  0xa3   :  { %v571_v3 = vpop.eup %570 }
  0xa4   :  { %v533_v4 = vpack.c.bf16 %v569_v2, %v571_v3 }
  0xa5   :  { %v188_v19 = vpop.permute.xlu1 %187 }
  0xa6   :  { %534 = vmatprep.subr.bf16.mxu0 %v533_v4  ;;  %v183_v21 = vpop.permute.xlu0 %182 }
  0xa7   :  { %536 = vmatpush3.bf16.msra.mxu0 %v533_v4 }
  0xa9   :  { %v198_v28 = vpop.permute.xlu1 %197 }
  0xaa   :  { %v573_v5 = vpop.eup %572  ;;  %v193_v30 = vpop.permute.xlu0 %192 }
  0xab   :  { %v575_v6 = vpop.eup %574 }
  0xac   :  { %v537_v7 = vpack.c.bf16 %v573_v5, %v575_v6 }
  0xad   :  { %v208_v35 = vpop.permute.xlu1 %207 }
  0xae   :  { %538 = vmatprep.subr.bf16.mxu0 %v537_v7  ;;  %v203_v38 = vpop.permute.xlu0 %202 }
  0xaf   :  { %540 = vmatpush3.bf16.msra.mxu0 %v537_v7 }
  0xb2   :  { %495 = vmatmul.mubr.msk.f32.vlgmr.msra.gmra.mrb[0].mxu0 %vm210_vm0, %v155_v8  ;;  %v353_v54 = vpop.permute.xlu0 %352 }
  0xb3   :  { %497 = vmatprep.mubr.msk.f32.mxu0 %vm210_vm0, %v156_v9 }
  0xb6   :  { %498 = vmatmul.mubr.msk.f32.gmra.mrb[2].mxu0 %vm210_vm0, %v157_v10 }
  0xb7   :  { %500 = vmatprep.mubr.msk.f32.mxu0 %vm210_vm0, %v158_v11 }
  0xba   :  { %501 = vmatmul.mubr.msk.f32.gmra.mrb[4].mxu0 %vm210_vm0, %v159_v12 }
  0xbb   :  { %503 = vmatprep.mubr.msk.f32.mxu0 %vm210_vm0, %v160_v13 }
  0xbe   :  { %504 = vmatmul.mubr.msk.f32.gmra.mrb[6].mxu0 %vm210_vm0, %v161_v14 }
 0x185   :  { %v496_v20 = vpop.f32.mrb[0].mxu0 }
 0x186   :  { %v307_v22 = vadd.f32 %v496_v20, %v178_v17  ;;  %v301_v23 = vpop.f32.mrb[1].mxu0 }
 0x187   :  { %v302_v24 = vadd.f32 %v301_v23, %v173_v18 }
 0x188   :  { %576 = vtanh.f32 %v307_v22 }
 0x189   :  { %578 = vtanh.f32 %v302_v24  ;;  %v499_v25 = vpop.f32.mrb[2].mxu0 }
 0x18a   :  { %v317_v26 = vadd.f32 %v499_v25, %v188_v19  ;;  %v311_v27 = vpop.f32.mrb[3].mxu0 }
 0x18b   :  { %v312_v29 = vadd.f32 %v311_v27, %v183_v21 }
 0x18c   :  { %580 = vtanh.f32 %v317_v26 }
 0x18d   :  { %582 = vtanh.f32 %v312_v29  ;;  %v502_v31 = vpop.f32.mrb[4].mxu0 }
 0x18e   :  { %v327_v32 = vadd.f32 %v502_v31, %v198_v28  ;;  %v321_v33 = vpop.f32.mrb[5].mxu0 }
 0x18f   :  { %v322_v34 = vadd.f32 %v321_v33, %v193_v30 }
 0x190   :  { %584 = vtanh.f32 %v327_v32 }
 0x191   :  { %586 = vtanh.f32 %v322_v34  ;;  %v505_v36 = vpop.f32.mrb[6].mxu0 }
 0x192   :  { %v577_v37 = vpop.eup %576  ;;  %v337_v39 = vadd.f32 %v505_v36, %v208_v35  ;;  %v331_v40 = vpop.f32.mrb[7].mxu0 }
 0x193   :  { %v579_v41 = vpop.eup %578  ;;  %v332_v42 = vadd.f32 %v331_v40, %v203_v38 }
 0x194   :  { %588 = vtanh.f32 %v337_v39  ;;  %v542_v43 = vpack.c.bf16 %v577_v37, %v579_v41 }
 0x195   :  { %590 = vtanh.f32 %v332_v42 }
 0x196   :  { %v581_v44 = vpop.eup %580  ;;  %543 = vmatpush3.bf16.msra.mxu1 %v542_v43 }
 0x197   :  { %v583_v45 = vpop.eup %582  ;;  %544 = vmatprep.subr.bf16.mxu1 %v617_v15 }
 0x198   :  { %v545_v46 = vpack.c.bf16 %v581_v44, %v583_v45 }
 0x19a   :  { %v585_v47 = vpop.eup %584  ;;  %546 = vmatpush3.bf16.msra.mxu1 %v545_v46 }
 0x19b   :  { %v587_v48 = vpop.eup %586  ;;  %547 = vmatprep.subr.bf16.mxu1 %v617_v15 }
 0x19c   :  { %v548_v49 = vpack.c.bf16 %v585_v47, %v587_v48 }
 0x19e   :  { %v589_v50 = vpop.eup %588  ;;  %549 = vmatpush3.bf16.msra.mxu1 %v548_v49 }
 0x19f   :  { %v591_v51 = vpop.eup %590  ;;  %550 = vmatprep.subr.bf16.mxu1 %v617_v15 }
 0x1a0   :  { %v551_v52 = vpack.c.bf16 %v589_v50, %v591_v51 }
 0x1a2   :  { %552 = vmatpush3.bf16.msra.mxu1 %v551_v52 }
 0x1a5   :  { %523 = vmatmul.mubr.msk.f32.vlgmr.msra.gmra.mrb[0].mxu1 %vm210_vm0, %v348_v53 }
 0x278   :  { %v424_v55 = vpop.f32.mrb[0].mxu1 }
 0x279   :  { %v425_v56 = vadd.f32 %v424_v55, %v353_v54  ;;  %v524_v57 = vpop.f32.mrb[1].mxu1 }
 0x27b   :  { %428 = vst [vmem:[#allocation2] sm:$0xff] %v425_v56 }
 0x27c   :  { %603 = shalt.err (!%p600_p4)
}
 0x27d   :  { %s604_s5 = scalar_lea.hbm %s794_s7, 128 }
 0x27e   :  { %p605_p5 = scmp.ne.s32.totalorder %s794_s7, %s604_s5  ;;  %p608_p6 = scmp.lt.u32.totalorder %s604_s5, %s794_s7 }
 0x280   :  { %p610_p7 = pnand %p608_p6, %p605_p5 }
 0x282   :  { %613 = shalt.err (!%p610_p7)
}
 0x283   :  { %438 = dma.vmem_to_hbm [thread:$0]  %s436_s18, 128, %s794_s7, [#allocation3]  }
 0x284   :  { %614 = dma.done.wait [#allocation3], 128  }
 0x285   :  { %615 = vsyncadd [#allocation3], 4294967168 }
 0x286   :  { %442 = vsyncpa [#allocation3], 1 }

</bundles_post_ra>
